<compile_context>
chip_gen: v6e
topology: v6e:2x2x1
jax: 0.10.0
libtpu: 0.0.40
codegen_flags: <defaults>
</compile_context>

<pallas_src>
import jax
import jax.numpy as jnp
from jax.experimental import pallas as pl
from jax.experimental.pallas import tpu as pltpu


def linear_kernel(xt_ref, wb_ref, ot_ref):
    # xt_ref: (in_f, TB)        lane-dense batch tile of x^T
    # wb_ref: (out_f, in_f + 1) [:, :in_f] = W (PyTorch layout), [:, in_f:] = bias
    # ot_ref: (out_f, TB)       lane-dense tile of y^T
    in_f = xt_ref.shape[0]
    wb = wb_ref[...]  # tiny: fits in one vreg after (8,128) padding

    # y^T = W @ x^T + b, written as 4 unrolled VPU broadcast-FMAs (no MXU pass):
    #   acc[o, b] = sum_k W[o, k] * xT[k, b]
    acc = wb[:, 0:1] * xt_ref[0:1, :]                 # (out_f,1)*(1,TB) -> (out_f,TB)
    for k in range(1, in_f):                          # static, fully unrolled (in_f=4)
        acc = acc + wb[:, k:k + 1] * xt_ref[k:k + 1, :]
    acc = acc + wb[:, in_f:in_f + 1]                  # + bias, broadcast along lanes
    ot_ref[...] = acc.astype(ot_ref.dtype)


def pack_params(weight, bias):
    """Pack PyTorch-layout weight (out_f, in_f) and bias (out_f,) into one slab.

    Call ONCE at parameter-init time (hoisted out of the per-call path).
    Returns (out_f, in_f + 1): columns [0:in_f] = W, column [in_f] = bias.
    """
    return jnp.concatenate([weight, bias[:, None]], axis=1)


# Lane-dense batch tile.  Padded VMEM footprint per buffer is
# ~8 sublanes * TILE_B lanes * 4 B for both the input and output tile, x2 for
# double buffering => ~128 * TILE_B bytes total, so even TILE_B = 8192 is < 1 MiB
# (safe on v7x's 64 MiB VMEM).  128 is plenty for Iris-scale batches.
TILE_B = 128


def simple_nn_forward(x, wb, *, tile_b=TILE_B):
    """Pallas implementation of SimpleNN.forward (Linear(4, 3)).

    x:  (B, in_f) float32 (PyTorch layout)
    wb: packed params from pack_params(), shape (out_f, in_f + 1)
    returns (B, out_f), identical to x @ W.T + b.
    """
    assert tile_b % 128 == 0, "batch tile must stay lane-dense (multiple of 128)"
    B, in_f = x.shape
    out_f = wb.shape[0]

    # Layout plumbing: batch on the lane axis, pad batch to a tile multiple.
    xt = x.T                                        # (in_f, B)
    bp = ((B + tile_b - 1) // tile_b) * tile_b
    if bp != B:
        xt = jnp.pad(xt, ((0, 0), (0, bp - B)))

    yt = pl.pallas_call(
        linear_kernel,
        out_shape=jax.ShapeDtypeStruct((out_f, bp), x.dtype),
        grid_spec=pltpu.PrefetchScalarGridSpec(
            num_scalar_prefetch=0,
            grid=(bp // tile_b,),
            in_specs=[
                # x^T: new lane-dense tile each grid step.
                pl.BlockSpec((in_f, tile_b), lambda i: (0, i)),
                # Packed W/b: same block every step -> DMA'd once, VMEM-resident.
                pl.BlockSpec((out_f, in_f + 1), lambda i: (0, 0)),
            ],
            out_specs=pl.BlockSpec((out_f, tile_b), lambda i: (0, i)),
        ),
        compiler_params=pltpu.CompilerParams(
            dimension_semantics=("parallel",),      # v7x: split batch across 2 TCs
        ),
    )(xt, wb)

    return yt[:, :B].T                              # back to PyTorch (B, out_f)


def init_params(key, in_features=4, out_features=3):
    """Deterministic init mimicking torch.nn.Linear default (U[-1/sqrt(fan_in), +])."""
    k_w, k_b = jax.random.split(key)
    bound = 1.0 / jnp.sqrt(jnp.float32(in_features))
    weight = jax.random.uniform(
        k_w, (out_features, in_features), jnp.float32, minval=-bound, maxval=bound
    )
    bias = jax.random.uniform(
        k_b, (out_features,), jnp.float32, minval=-bound, maxval=bound
    )
    return weight, bias


if __name__ == "__main__":
    key = jax.random.PRNGKey(0)
    k_x, k_p = jax.random.split(key)

    # Iris-like input: 150 samples, 4 features each (padded to 256 internally).
    B, IN_F, OUT_F = 150, 4, 3
    x = jax.random.normal(k_x, (B, IN_F), dtype=jnp.float32)
    weight, bias = init_params(k_p, IN_F, OUT_F)

    # Pack parameters ONCE (init-time), not per forward call.
    wb = pack_params(weight, bias)

    y = simple_nn_forward(x, wb)
    y = jax.block_until_ready(y)

    # Reference: exact nn.Linear semantics.
    y_ref = x @ weight.T + bias
    assert y.shape == (B, OUT_F)
    assert jnp.allclose(y, y_ref, atol=1e-5, rtol=1e-5)

    print("KERNEL_OK")
</pallas_src>

<mosaic_0001>
module attributes {stable_mosaic.version = 11 : i64} {
  func.func @linear_kernel(%arg0: i32, %arg1: memref<4x128xf32, #tpu.memory_space<vmem>>, %arg2: memref<3x5xf32, #tpu.memory_space<vmem>>, %arg3: memref<3x128xf32, #tpu.memory_space<vmem>>) attributes {dimension_semantics = [#tpu.dimension_semantics<parallel>], iteration_bounds = array<i64: 2>, scalar_prefetch = 0 : i64, scratch_operands = 0 : i64, tpu.core_type = #tpu.core_type<tc>, window_params = [{transform_indices = @transform_0, window_bounds = array<i64: 4, 128>}, {pipeline_mode = #tpu.pipeline_mode<synchronous>, transform_indices = @transform_1, window_bounds = array<i64: 3, 5>}, {transform_indices = @transform_2, window_bounds = array<i64: 3, 128>}]} {
    %c0 = arith.constant 0 : index
    %c0_0 = arith.constant 0 : index
    %0 = vector.load %arg2[%c0, %c0_0] : memref<3x5xf32, #tpu.memory_space<vmem>>, vector<3x5xf32>
    %1 = vector.extract_strided_slice %0 {offsets = [0, 0], sizes = [3, 1], strides = [1, 1]} : vector<3x5xf32> to vector<3x1xf32>
    %c0_1 = arith.constant 0 : index
    %c0_2 = arith.constant 0 : index
    %2 = vector.load %arg1[%c0_1, %c0_2] : memref<4x128xf32, #tpu.memory_space<vmem>>, vector<1x128xf32>
    %3 = vector.broadcast %1 : vector<3x1xf32> to vector<3x128xf32>
    %4 = vector.broadcast %2 : vector<1x128xf32> to vector<3x128xf32>
    %5 = arith.mulf %3, %4 : vector<3x128xf32>
    %6 = vector.extract_strided_slice %0 {offsets = [0, 1], sizes = [3, 1], strides = [1, 1]} : vector<3x5xf32> to vector<3x1xf32>
    %c1 = arith.constant 1 : index
    %c0_3 = arith.constant 0 : index
    %7 = vector.load %arg1[%c1, %c0_3] : memref<4x128xf32, #tpu.memory_space<vmem>>, vector<1x128xf32>
    %8 = vector.broadcast %6 : vector<3x1xf32> to vector<3x128xf32>
    %9 = vector.broadcast %7 : vector<1x128xf32> to vector<3x128xf32>
    %10 = arith.mulf %8, %9 : vector<3x128xf32>
    %11 = arith.addf %5, %10 : vector<3x128xf32>
    %12 = vector.extract_strided_slice %0 {offsets = [0, 2], sizes = [3, 1], strides = [1, 1]} : vector<3x5xf32> to vector<3x1xf32>
    %c2 = arith.constant 2 : index
    %c0_4 = arith.constant 0 : index
    %13 = vector.load %arg1[%c2, %c0_4] : memref<4x128xf32, #tpu.memory_space<vmem>>, vector<1x128xf32>
    %14 = vector.broadcast %12 : vector<3x1xf32> to vector<3x128xf32>
    %15 = vector.broadcast %13 : vector<1x128xf32> to vector<3x128xf32>
    %16 = arith.mulf %14, %15 : vector<3x128xf32>
    %17 = arith.addf %11, %16 : vector<3x128xf32>
    %18 = vector.extract_strided_slice %0 {offsets = [0, 3], sizes = [3, 1], strides = [1, 1]} : vector<3x5xf32> to vector<3x1xf32>
    %c3 = arith.constant 3 : index
    %c0_5 = arith.constant 0 : index
    %19 = vector.load %arg1[%c3, %c0_5] : memref<4x128xf32, #tpu.memory_space<vmem>>, vector<1x128xf32>
    %20 = vector.broadcast %18 : vector<3x1xf32> to vector<3x128xf32>
    %21 = vector.broadcast %19 : vector<1x128xf32> to vector<3x128xf32>
    %22 = arith.mulf %20, %21 : vector<3x128xf32>
    %23 = arith.addf %17, %22 : vector<3x128xf32>
    %24 = vector.extract_strided_slice %0 {offsets = [0, 4], sizes = [3, 1], strides = [1, 1]} : vector<3x5xf32> to vector<3x1xf32>
    %25 = vector.broadcast %24 : vector<3x1xf32> to vector<3x128xf32>
    %26 = arith.addf %23, %25 : vector<3x128xf32>
    %c0_6 = arith.constant 0 : index
    %c0_7 = arith.constant 0 : index
    %27 = vector.load %arg3[%c0_6, %c0_7] : memref<3x128xf32, #tpu.memory_space<vmem>>, vector<3x128xf32>
    tpu.vector_store %arg3[%c0_6, %c0_7], %26 {strides = array<i32>} : memref<3x128xf32, #tpu.memory_space<vmem>>, vector<3x128xf32>,
    return
  }
  func.func @transform_0(%arg0: i32) -> (i32, i32) {
    %c0_i32 = arith.constant 0 : i32
    %c0_i32_0 = arith.constant 0 : i32
    return %c0_i32, %arg0 : i32, i32
  }
  func.func @transform_1(%arg0: i32) -> (i32, i32) {
    %c0_i32 = arith.constant 0 : i32
    %c0_i32_0 = arith.constant 0 : i32
    %c0_i32_1 = arith.constant 0 : i32
    return %c0_i32, %c0_i32_0 : i32, i32
  }
  func.func @transform_2(%arg0: i32) -> (i32, i32) {
    %c0_i32 = arith.constant 0 : i32
    %c0_i32_0 = arith.constant 0 : i32
    return %c0_i32, %arg0 : i32, i32
  }
}

</mosaic_0001>

<bundles_post_ra>
// kernel: tpu_custom_call.1
= control target key start
LH: loop header
LB: loop body
LE: loop exit
PB: predicated region body
PF: predicated region fallthrough
CT: control target
= control target key end

     0   :  { %7 = vsyncpa [#allocation3], 0  ;;  %s720_s0 = inlined_call_operand.hbm [shape: f32[4,256], index: 0, kind: input, shape index: {}]   ;;  %s721_s1 = inlined_call_operand.hbm [shape: f32[3,5], index: 1, kind: input, shape index: {}]   ;;  %s722_s2 = inlined_call_operand.hbm [shape: f32[3,256], index: 2, kind: output, shape index: {}]  }
   0x1   :  { %9 = vsyncpa [#allocation3 + $0x1], 0 }
   0x2   :  { %10 = vsyncpa [#allocation6], 0 }
   0x3   :  { %11 = vsyncpa [#allocation4], 0 }
   0x4   :  { %13 = vsyncpa [#allocation4 + $0x1], 0  ;;  %s550_s9 = smov 0   ;;  %s552_s10 = smov 0  }
   0x5   :  { %s554_s11 = smov 0   ;;  %s556_s12 = smov 0  }
   0x6 LB: > { %s571_s13 = sadd.s32 4294967295, %s525_s12   ;;  %s317_s14 = sadd.s32 4294967294, %s525_s12   ;;  %s525_s12 = sphi %s556_s12, %s745_s12   ;;  %s521_s11 = sphi %s554_s11, %s744_s11   ;;  %s517_s10 = sphi %s552_s10, %s743_s10   ;;  %s513_s9 = sphi %s550_s9, %s742_s9  }
   0x7   : > { %p39_p0 = scmp.ne.s32.totalorder %s517_s10, %s513_s9  ;;  %p723_p1 = scmp.eq.s32.totalorder %s571_s13, 0 }
   0x8   : > { %p90_p3 = scmp.eq.s32.totalorder %s317_s14, 1  ;;  %p318_p5 = scmp.ge.s32.totalorder %s525_s12, 1 }
   0x9   : > { %p580_p4 = por %p723_p1, %p39_p0  ;;  %p97_p7 = scmp.lt.s32.totalorder %s525_s12, 3 }
   0xa   : > { %p585_p6 = por %p90_p3, %p39_p0  ;;  %s527_s18 = smov [#allocation5]  }
   0xb   : > { %s727_s15 = scalar_select %p580_p4, 1, 0 }
   0xc   : > { %s728_s16 = scalar_select %p585_p6, 1, 0 }
   0xd   : > { %p590_p8 = pnand %p318_p5, %p97_p7  ;;  %s110_s19 = sshll.u32 %s527_s18, 4  ;;  %s111_s19 = int_to_ptr.vmem [resolvable:$true] %s110_s19 }
   0xe   : > { %s598_s20 = sadd.s32 1, %s525_s12   ;;  %s26_s24 = sadd.s32 1, %s521_s11 }
   0xf   : > { %s729_s17 = scalar_select %p590_p8, 1, 0 }
  0x10   : > { %p343_p10 = pneg %p590_p8  ;;  %s23_s22 = ssub.s32 %s525_s12, %s598_s20 }
  0x11   : > { %p608_p12 = scmp.eq.s32.totalorder %s23_s22, 0  ;;  %p33_p13 = scmp.ne.s32.totalorder %s521_s11, %s517_s10 }
  0x12   : > { %p602_p11 = pnand %p343_p10, %p723_p1  ;;  %s414_s25 = scalar_lea.vmem %s111_s19, 64 }
  0x13   : > { %p415_p3 = scmp.ne.s32.totalorder %s111_s19, %s414_s25  ;;  %p422_p9 = scmp.lt.s32.totalorder %s111_s19, %s111_s19 }
  0x14   : > { %p405_p0 = pneg %p602_p11  ;;  %p423_p2 = scmp.lt.s32.totalorder %s414_s25, %s414_s25 }
  0x16   : > { %p417_p5 = pnand %p415_p3, %p405_p0  ;;  %p424_p10 = por %p423_p2, %p422_p9 }
  0x18   : > { %p418_p7 = pneg %p417_p5 }
  0x1a   : > { %p425_p1 = pnand %p424_p10, %p418_p7 }
  0x1c   : > { %428 = shalt.err (!%p425_p1)
}
  0x1d   : > { %346 = dma.hbm_to_vmem [thread:$0]  (!%p602_p11), %s721_s1, 64, %s111_s19, [#allocation6]  }
  0x1e   : > { %s625_s28 = scalar_select %p608_p12, %s521_s11, %s26_s24  }
  0x1f   : > { %p34_p1 = scmp.eq.s32.totalorder %s525_s12, 0  ;;  %p732_p2 = scmp.eq.s32.totalorder %s571_s13, 1 }
  0x20   : > { %p356_p0 = scmp.lt.s32.totalorder %s525_s12, 2  ;;  %s121_s30 = sand.u32 1, %s521_s11  }
  0x21   : > { %p633_p9 = por %p732_p2, %p33_p13  ;;  %p35_p3 = por %p34_p1, %p33_p13 }
  0x22   : > { %s321_s3 = sshll.u32 %s121_s30, 2  ;;  %s322_s4 = sshll.u32 %s525_s12, 6 }
  0x23   : > { %s733_s29 = scalar_select %p633_p9, 1, 0 }
  0x24   : > { %s646_s7 = scalar_lea.hbm %s720_s0, %s322_s4  ;;  %s125_s8 = scalar_lea.vmem [#allocation2], %s321_s3 }
  0x25   : > { %s132_s14 = sshll.u32 %s125_s8, 4  ;;  %p648_p11 = pnand %p356_p0, %p35_p3  ;;  %s133_s14 = int_to_ptr.vmem [resolvable:$true] %s132_s14 }
  0x26   : > { %s122_s19 = scalar_lea.sflag [#allocation3], %s121_s30  ;;  %s429_s21 = scalar_lea.hbm %s646_s7, 64 }
  0x27   : > { %p430_p12 = scmp.ne.s32.totalorder %s646_s7, %s429_s21  ;;  %p431_p13 = pneg %p648_p11 }
  0x28   : > { %s434_s24 = scalar_lea.hbm %s720_s0, 128  ;;  %p435_p10 = scmp.lt.s32.totalorder %s646_s7, %s720_s0 }
  0x29   : > { %p432_p5 = pnand %p431_p13, %p430_p12  ;;  %p436_p1 = scmp.lt.s32.totalorder %s434_s24, %s429_s21 }
  0x2b   : > { %p433_p7 = pneg %p432_p5  ;;  %p437_p2 = por %p436_p1, %p435_p10 }
  0x2d   : > { %p438_p0 = pnand %p437_p2, %p433_p7 }
  0x2f   : > { %441 = shalt.err (!%p438_p0)
}
  0x30   : > { %s442_s27 = scalar_lea.vmem %s133_s14, 64  ;;  %s528_s30 = smov [#allocation2]  }
  0x31   : > { %p443_p3 = scmp.ne.s32.totalorder %s133_s14, %s442_s27  ;;  %s447_s3 = sshll.u32 %s528_s30, 4  ;;  %s448_s3 = int_to_ptr.vmem [resolvable:$false] %s447_s3 }
  0x32   : > { %s449_s4 = scalar_lea.vmem %s448_s3, 128  ;;  %p450_p12 = scmp.lt.s32.totalorder %s133_s14, %s448_s3 }
  0x33   : > { %p445_p6 = pnand %p443_p3, %p431_p13  ;;  %p451_p5 = scmp.lt.s32.totalorder %s449_s4, %s442_s27 }
  0x35   : > { %p446_p9 = pneg %p445_p6  ;;  %p452_p4 = por %p451_p5, %p450_p12 }
  0x37   : > { %p453_p8 = pnand %p452_p4, %p446_p9 }
  0x39   : > { %456 = shalt.err (!%p453_p8)
}
  0x3a   : > { %350 = dma.hbm_to_vmem [thread:$0]  (!%p648_p11), %s646_s7, 64, %s133_s14, %s122_s19  }
  0x3b   : > { %p735_p7 = scmp.ne.s32.totalorder %s729_s17, 0 }
  0x3c   : > { %s669_s5 = sand.u32 (!%p735_p7), 1, %s517_s10   ;;  %p736_p4 = scmp.ne.s32.totalorder (!%p735_p7), %s727_s15, 0 }
  0x3d   : > { %141 = sbr.rel (%p735_p7) target bundleno = 224 (0xe0), region = 28  ;;  %s324_s6 = sshll.u32 (!%p735_p7), %s669_s5, 2 }
  0x3e   : > { %s144_s8 = scalar_lea.sflag (!%p735_p7), [#allocation3], %s669_s5  ;;  %s147_s21 = scalar_lea.vmem (!%p735_p7), [#allocation2], %s324_s6 }
  0x42   : > { %500 = dma.done.wait (%p736_p4), %s144_s8, 64  }
  0x43   : > { %502 = vsyncadd (%p736_p4), %s144_s8, 4294967232  ;;  %p737_p6 = scmp.eq.s32.totalorder %s571_s13, 0 }
  0x45   : > { %504 = dma.done.wait (%p737_p6), [#allocation6], 64   ;;  %p738_p8 = pmov %p737_p6 }
  0x46   : > { %v529_v0 = vmov 0   ;;  %v530_v1 = vmov 2   ;;  %v172_v2 = vld [vmem:[#allocation5] sm:$0x7]  ;;  %v531_v3 = vmov 1   ;;  %v532_v4 = vmov 3  }
  0x47   : > { %506 = vsyncadd (%p738_p8), [#allocation6], 4294967232  ;;  %397 = vset.pattern.permute.xlu0 %v529_v0  ;;  %399 = vset.pattern.permute.xlu1 %v530_v1  ;;  %v533_v5 = vmov 4   ;;  %v327_v8 = vld [vmem:[%s147_s21] ss:$0 sm:$0xff]  ;;  %s332_s15 = sshll.u32 %s571_s13, 6 }
  0x48   : > { %176 = vperm.xlu0 %397, %v172_v2   ;;  %197 = vperm.xlu1 %399, %v172_v2   ;;  %v328_v9 = vld [vmem:[%s147_s21 + $0x1] ss:$0 sm:$0xff]  ;;  %v329_v10 = vld [vmem:[%s147_s21 + $0x2] ss:$0 sm:$0xff]  ;;  %v330_v12 = vld [vmem:[%s147_s21 + $0x3] ss:$0 sm:$0xff]  ;;  %s235_s19 = scalar_lea.hbm %s722_s2, %s332_s15 }
  0x49   : > { %s171_s17 = scalar_lea.vmem [#allocation7], %s324_s6  ;;  %s224_s22 = scalar_lea.sflag [#allocation4], %s669_s5 }
  0x4a   : > { %s237_s7 = sshll.u32 %s171_s17, 4  ;;  %p739_p11 = scmp.ne.s32.totalorder %s733_s29, 0  ;;  %s238_s7 = int_to_ptr.vmem [resolvable:$true] %s237_s7 }
  0x4b   : > { %s457_s23 = scalar_lea.vmem %s238_s7, 64  ;;  %s534_s24 = smov [#allocation7]  }
  0x4c   : > { %398 = vset.pattern.permute.xlu0 %v531_v3  ;;  %400 = vset.pattern.permute.xlu1 %v532_v4  ;;  %p458_p9 = scmp.ne.s32.totalorder %s238_s7, %s457_s23  ;;  %s461_s25 = sshll.u32 %s534_s24, 4  ;;  %s462_s25 = int_to_ptr.vmem [resolvable:$false] %s461_s25 }
  0x4d   : > { %186 = vperm.xlu0 %398, %v172_v2   ;;  %208 = vperm.xlu1 %400, %v172_v2   ;;  %s463_s13 = scalar_lea.vmem %s462_s25, 128  ;;  %p464_p1 = scmp.lt.s32.totalorder %s238_s7, %s462_s25 }
  0x4e   : > { %p459_p13 = pnand %p458_p9, %p739_p11  ;;  %p465_p2 = scmp.lt.s32.totalorder %s463_s13, %s457_s23 }
  0x50   : > { %p460_p10 = pneg %p459_p13  ;;  %p466_p0 = por %p465_p2, %p464_p1 }
  0x51   : > { %401 = vset.pattern.permute.xlu1 %v533_v5  ;;  %402 = vset.pattern.permute.xlu0 %v533_v5 }
  0x52   : > { %218 = vperm.xlu1 %401, %v172_v2   ;;  %p467_p3 = pnand %p466_p0, %p460_p10 }
  0xc3   : > { %v177_v6 = vpop.permute.xlu0 %176  ;;  %v198_v7 = vpop.permute.xlu1 %197 }
  0xc4   : > { %v183_v14 = vmul.f32 %v327_v8, %v177_v6  ;;  %v204_v16 = vmul.f32 %v329_v10, %v198_v7 }
  0xc8   : > { %v187_v11 = vpop.permute.xlu0 %186  ;;  %v209_v13 = vpop.permute.xlu1 %208 }
  0xc9   : > { %v193_v15 = vmul.f32 %v328_v9, %v187_v11  ;;  %v215_v18 = vmul.f32 %v330_v12, %v209_v13 }
  0xcb   : > { %v194_v17 = vadd.f32 %v193_v15, %v183_v14 }
  0xcd   : > { %v205_v19 = vadd.f32 %v204_v16, %v194_v17  ;;  %v219_v20 = vpop.permute.xlu1 %218 }
  0xcf   : > { %v216_v21 = vadd.f32 %v215_v18, %v205_v19 }
  0xd1   : > { %v221_v22 = vadd.f32 %v219_v20, %v216_v21 }
  0xd3   : > { %222 = vst [vmem:[%s171_s17] sm:$0x7] %v221_v22 }
  0xd4   : > { %470 = shalt.err (!%p467_p3)
}
  0xd5   : > { %s471_s26 = scalar_lea.hbm %s235_s19, 64  ;;  %s475_s3 = scalar_lea.hbm %s722_s2, 128 }
  0xd6   : > { %p472_p12 = scmp.ne.s32.totalorder %s235_s19, %s471_s26  ;;  %p476_p4 = scmp.lt.s32.totalorder %s235_s19, %s722_s2 }
  0xd7   : > { %p477_p6 = scmp.lt.s32.totalorder %s475_s3, %s471_s26 }
  0xd8   : > { %p473_p5 = pnand %p472_p12, %p739_p11 }
  0xd9   : > { %p478_p8 = por %p477_p6, %p476_p4 }
  0xda   : > { %p474_p7 = pneg %p473_p5 }
  0xdc   : > { %p479_p9 = pnand %p478_p8, %p474_p7 }
  0xde   : > { %482 = shalt.err (!%p479_p9)
}
  0xdf   : > { %341 = dma.vmem_to_hbm [thread:$0]  (%p739_p11), %s238_s7, 64, %s235_s19, %s224_s22  }
  0xe0 PF: > { %s249_s6 = sand.u32 1, %s513_s9   ;;  %p740_p13 = scmp.ne.s32.totalorder %s728_s16, 0 }
  0xe1   : > { %p741_p10 = scmp.ge.s32.totalorder %s525_s12, 2  ;;  %s250_s8 = scalar_lea.sflag [#allocation4], %s249_s6 }
  0xe3   : > { %p352_p1 = pnand %p741_p10, %p740_p13 }
  0xe5   : > { %p353_p2 = pneg %p352_p1 }
  0xe7   : > { %508 = dma.done.wait (%p353_p2), %s250_s8, 64  }
  0xe8   : > { %510 = vsyncadd (%p353_p2), %s250_s8, 4294967232  ;;  %p16_p0 = scmp.ge.s32.totalorder %s598_s20, 4   ;;  %s742_s9 = smov %s517_s10 }
  0xe9   : > { %s743_s10 = smov %s521_s11  ;;  %s744_s11 = smov %s625_s28 }
  0xea   : > { %s745_s12 = smov %s598_s20  ;;  %18 = sbr.rel (!%p16_p0) target bundleno = 6 (0x6), region = 77 }
  0xef   :  { %255 = vsyncpa [#allocation3], 1 }
  0xf0   :  { %257 = vsyncpa [#allocation3 + $0x1], 1 }
  0xf1   :  { %258 = vsyncpa [#allocation6], 1 }
  0xf2   :  { %259 = vsyncpa [#allocation4], 1 }
  0xf3   :  { %261 = vsyncpa [#allocation4 + $0x1], 1 }

</bundles_post_ra>
